<compile_context>
chip_gen: v6e
topology: v6e:2x2x1
jax: 0.10.0
libtpu: 0.0.40
codegen_flags: <defaults>
</compile_context>

<pallas_src>
import functools

import jax
import jax.numpy as jnp
from jax.experimental import pallas as pl
from jax.experimental.pallas import tpu as pltpu

DATA_DIM = 88          # int(prod([1, 88]))
HIDDEN_DIM = 64
ETA = 1e-6             # Constants.eta in the MMVAE codebase


def _round_up(n, m):
    return ((n + m - 1) // m) * m


def _enc_kernel(x_ref, w1_ref, b1_ref, w2_ref, b2_ref, wh_ref, bh_ref, out_ref):
    """One batch tile of the full fused forward pass (weights VMEM-resident)."""
    L = wh_ref.shape[0]                                               # static

    x = x_ref[...]                                                    # [TB, 88]

    h = jnp.tanh(jnp.dot(x, w1_ref[...],
                         preferred_element_type=jnp.float32) + b1_ref[...])
    e = jnp.tanh(jnp.dot(h, w2_ref[...],
                         preferred_element_type=jnp.float32) + b2_ref[...])

    # Fused heads: [TB, 2L] = e @ [L, 2L]  (mu in lanes [0:L], lv in [L:2L]).
    heads = jnp.dot(e, wh_ref[...],
                    preferred_element_type=jnp.float32) + bh_ref[...]
    mu = heads[:, :L]
    lv = heads[:, L:]

    # Numerically stable softmax along the last (lane) axis.
    m = jnp.max(lv, axis=-1, keepdims=True)
    p = jnp.exp(lv - m)
    inv = pl.reciprocal(jnp.sum(p, axis=-1, keepdims=True), approx=True)
    scaled = p * inv * jnp.float32(L) + jnp.float32(ETA)

    # Single lane-dense store of the combined (TB, 2L) slab.
    out_ref[...] = jnp.concatenate([mu, scaled], axis=-1)


@functools.partial(jax.jit, static_argnames=("latent_dim", "block_rows"))
def enc_forward(x, params, latent_dim, block_rows=512):
    """x: (..., 88) float32. Returns (mu, softmax(lv)*L + eta), each (..., L)."""
    lead = x.shape[:-1]
    xb = x.reshape(-1, DATA_DIM).astype(jnp.float32)                  # [B, 88]
    B = xb.shape[0]
    L = latent_dim

    w1, b1, w2, b2, w21, b21, w22, b22 = params
    # Fuse the two head projections into a single [L, 2L] matmul.
    wh = jnp.concatenate([w21, w22], axis=1)                          # [L, 2L]
    bh = jnp.concatenate([b21, b22], axis=1)                          # [1, 2L]

    # Batch tiling: TB multiple of 8 (sublane), pad B up to a multiple of TB.
    TB = min(block_rows, _round_up(B, 8))
    B_pad = _round_up(B, TB)
    if B_pad != B:
        xb = jnp.pad(xb, ((0, B_pad - B), (0, 0)))
    grid = (B_pad // TB,)

    vmem = pltpu.MemorySpace.VMEM

    def tile_spec(shape):
        return pl.BlockSpec(shape, lambda i: (i, 0), memory_space=vmem)

    def resident_spec(shape):
        # Constant index_map -> block stays VMEM-resident across grid steps.
        return pl.BlockSpec(shape, lambda i: (0, 0), memory_space=vmem)

    weight_bytes = 4 * (DATA_DIM * HIDDEN_DIM + HIDDEN_DIM
                        + HIDDEN_DIM * L + L
                        + L * 2 * L + 2 * L)
    cost = pl.CostEstimate(
        flops=2 * B_pad * (DATA_DIM * HIDDEN_DIM + HIDDEN_DIM * L + 2 * L * L),
        transcendentals=B_pad * (HIDDEN_DIM + 2 * L),
        bytes_accessed=4 * B_pad * (DATA_DIM + 4 * L) + weight_bytes,
    )

    out = pl.pallas_call(
        _enc_kernel,
        out_shape=jax.ShapeDtypeStruct((B_pad, 2 * L), jnp.float32),
        grid=grid,
        in_specs=[
            tile_spec((TB, DATA_DIM)),                 # x
            resident_spec((DATA_DIM, HIDDEN_DIM)),     # w1
            resident_spec((1, HIDDEN_DIM)),            # b1
            resident_spec((HIDDEN_DIM, L)),            # w2
            resident_spec((1, L)),                     # b2
            resident_spec((L, 2 * L)),                 # fused heads weight
            resident_spec((1, 2 * L)),                 # fused heads bias
        ],
        out_specs=tile_spec((TB, 2 * L)),
        compiler_params=pltpu.CompilerParams(
            dimension_semantics=("parallel",)),
        cost_estimate=cost,
    )(xb, w1, b1, w2, b2, wh, bh)

    out = out[:B]
    mu = out[:, :L].reshape(*lead, L)
    scaled = out[:, L:].reshape(*lead, L)
    return mu, scaled


def init_params(key, latent_dim):
    """Deterministic synthetic parameters matching nn.Linear shapes.

    PyTorch stores Linear weight as [out, in]; we pre-transpose to [in, out]
    so the kernel can do `x @ W`.  Biases are kept as [1, out] (2-D for VMEM).
    """
    ks = jax.random.split(key, 8)

    def linear(kw, kb, fan_in, fan_out):
        bound = 1.0 / jnp.sqrt(jnp.float32(fan_in))
        w = jax.random.uniform(kw, (fan_in, fan_out), jnp.float32, -bound, bound)
        b = jax.random.uniform(kb, (1, fan_out), jnp.float32, -bound, bound)
        return w, b

    w1, b1 = linear(ks[0], ks[1], DATA_DIM, HIDDEN_DIM)      # linear1
    w2, b2 = linear(ks[2], ks[3], HIDDEN_DIM, latent_dim)    # enc
    w21, b21 = linear(ks[4], ks[5], latent_dim, latent_dim)  # fc21
    w22, b22 = linear(ks[6], ks[7], latent_dim, latent_dim)  # fc22
    return (w1, b1, w2, b2, w21, b21, w22, b22)


def enc_forward_ref(x, params, latent_dim):
    """Pure-JAX reference for a correctness check."""
    w1, b1, w2, b2, w21, b21, w22, b22 = params
    h = jnp.tanh(x @ w1 + b1)
    e = jnp.tanh(h @ w2 + b2)
    mu = e @ w21 + b21
    lv = e @ w22 + b22
    return mu, jax.nn.softmax(lv, axis=-1) * latent_dim + ETA


if __name__ == "__main__":
    LATENT_DIM = 16
    BATCH = 8

    key = jax.random.PRNGKey(0)
    k_params, k_x = jax.random.split(key)

    params = init_params(k_params, LATENT_DIM)
    # Module input mirrors dataSize = [1, 88]  ->  (B, 1, 88)
    x = jax.random.normal(k_x, (BATCH, 1, DATA_DIM), dtype=jnp.float32)

    mu, scaled = enc_forward(x, params, LATENT_DIM)
    jax.block_until_ready((mu, scaled))

    mu_ref, scaled_ref = enc_forward_ref(x, params, LATENT_DIM)
    assert mu.shape == (BATCH, 1, LATENT_DIM)
    assert scaled.shape == (BATCH, 1, LATENT_DIM)
    assert jnp.allclose(mu, mu_ref, atol=1e-5, rtol=1e-5)
    # scaled uses the approximate EUP reciprocal -> slightly looser tolerance.
    assert jnp.allclose(scaled, scaled_ref, atol=1e-4, rtol=1e-2)

    print("KERNEL_OK")
</pallas_src>

<mosaic_0001>
module attributes {stable_mosaic.version = 11 : i64} {
  func.func @_enc_kernel(%arg0: i32, %arg1: memref<8x88xf32, #tpu.memory_space<vmem>>, %arg2: memref<88x64xf32, #tpu.memory_space<vmem>>, %arg3: memref<1x64xf32, #tpu.memory_space<vmem>>, %arg4: memref<64x16xf32, #tpu.memory_space<vmem>>, %arg5: memref<1x16xf32, #tpu.memory_space<vmem>>, %arg6: memref<16x32xf32, #tpu.memory_space<vmem>>, %arg7: memref<1x32xf32, #tpu.memory_space<vmem>>, %arg8: memref<8x32xf32, #tpu.memory_space<vmem>>) attributes {dimension_semantics = [#tpu.dimension_semantics<parallel>], iteration_bounds = array<i64: 1>, scalar_prefetch = 0 : i64, scratch_operands = 0 : i64, tpu.core_type = #tpu.core_type<tc>, window_params = [{transform_indices = @transform_0, window_bounds = array<i64: 8, 88>}, {pipeline_mode = #tpu.pipeline_mode<synchronous>, transform_indices = @transform_1, window_bounds = array<i64: 88, 64>}, {pipeline_mode = #tpu.pipeline_mode<synchronous>, transform_indices = @transform_2, window_bounds = array<i64: 1, 64>}, {pipeline_mode = #tpu.pipeline_mode<synchronous>, transform_indices = @transform_3, window_bounds = array<i64: 64, 16>}, {pipeline_mode = #tpu.pipeline_mode<synchronous>, transform_indices = @transform_4, window_bounds = array<i64: 1, 16>}, {pipeline_mode = #tpu.pipeline_mode<synchronous>, transform_indices = @transform_5, window_bounds = array<i64: 16, 32>}, {pipeline_mode = #tpu.pipeline_mode<synchronous>, transform_indices = @transform_6, window_bounds = array<i64: 1, 32>}, {transform_indices = @transform_7, window_bounds = array<i64: 8, 32>}]} {
    %c0 = arith.constant 0 : index
    %c0_0 = arith.constant 0 : index
    %0 = vector.load %arg1[%c0, %c0_0] : memref<8x88xf32, #tpu.memory_space<vmem>>, vector<8x88xf32>
    %c0_1 = arith.constant 0 : index
    %c0_2 = arith.constant 0 : index
    %1 = vector.load %arg2[%c0_1, %c0_2] : memref<88x64xf32, #tpu.memory_space<vmem>>, vector<88x64xf32>
    %cst = arith.constant dense<0.000000e+00> : vector<8x64xf32>
    %2 = tpu.matmul %0, %1, %cst {dimension_numbers = #tpu.dot_dimension_numbers<[1], [0], [0], [1], [0, 0, 1, 1], [], []>} : vector<8x88xf32>, vector<88x64xf32>, vector<8x64xf32> -> vector<8x64xf32>
    %c0_3 = arith.constant 0 : index
    %c0_4 = arith.constant 0 : index
    %3 = vector.load %arg3[%c0_3, %c0_4] : memref<1x64xf32, #tpu.memory_space<vmem>>, vector<1x64xf32>
    %4 = vector.broadcast %3 : vector<1x64xf32> to vector<8x64xf32>
    %5 = arith.addf %2, %4 : vector<8x64xf32>
    %6 = math.tanh %5 : vector<8x64xf32>
    %c0_5 = arith.constant 0 : index
    %c0_6 = arith.constant 0 : index
    %7 = vector.load %arg4[%c0_5, %c0_6] : memref<64x16xf32, #tpu.memory_space<vmem>>, vector<64x16xf32>
    %cst_7 = arith.constant dense<0.000000e+00> : vector<8x16xf32>
    %8 = tpu.matmul %6, %7, %cst_7 {dimension_numbers = #tpu.dot_dimension_numbers<[1], [0], [0], [1], [0, 0, 1, 1], [], []>} : vector<8x64xf32>, vector<64x16xf32>, vector<8x16xf32> -> vector<8x16xf32>
    %c0_8 = arith.constant 0 : index
    %c0_9 = arith.constant 0 : index
    %9 = vector.load %arg5[%c0_8, %c0_9] : memref<1x16xf32, #tpu.memory_space<vmem>>, vector<1x16xf32>
    %10 = vector.broadcast %9 : vector<1x16xf32> to vector<8x16xf32>
    %11 = arith.addf %8, %10 : vector<8x16xf32>
    %12 = math.tanh %11 : vector<8x16xf32>
    %c0_10 = arith.constant 0 : index
    %c0_11 = arith.constant 0 : index
    %13 = vector.load %arg6[%c0_10, %c0_11] : memref<16x32xf32, #tpu.memory_space<vmem>>, vector<16x32xf32>
    %cst_12 = arith.constant dense<0.000000e+00> : vector<8x32xf32>
    %14 = tpu.matmul %12, %13, %cst_12 {dimension_numbers = #tpu.dot_dimension_numbers<[1], [0], [0], [1], [0, 0, 1, 1], [], []>} : vector<8x16xf32>, vector<16x32xf32>, vector<8x32xf32> -> vector<8x32xf32>
    %c0_13 = arith.constant 0 : index
    %c0_14 = arith.constant 0 : index
    %15 = vector.load %arg7[%c0_13, %c0_14] : memref<1x32xf32, #tpu.memory_space<vmem>>, vector<1x32xf32>
    %16 = vector.broadcast %15 : vector<1x32xf32> to vector<8x32xf32>
    %17 = arith.addf %14, %16 : vector<8x32xf32>
    %18 = vector.extract_strided_slice %17 {offsets = [0, 0], sizes = [8, 16], strides = [1, 1]} : vector<8x32xf32> to vector<8x16xf32>
    %19 = vector.extract_strided_slice %17 {offsets = [0, 16], sizes = [8, 16], strides = [1, 1]} : vector<8x32xf32> to vector<8x16xf32>
    %cst_15 = arith.constant dense<0xFF800000> : vector<8xf32>
    %20 = vector.multi_reduction <maximumf>, %19, %cst_15 [1] : vector<8x16xf32> to vector<8xf32>
    %21 = vector.shape_cast %20 : vector<8xf32> to vector<8x1xf32>
    %22 = vector.broadcast %21 : vector<8x1xf32> to vector<8x16xf32>
    %23 = arith.subf %19, %22 : vector<8x16xf32>
    %24 = math.exp %23 : vector<8x16xf32>
    %cst_16 = arith.constant dense<0.000000e+00> : vector<8xf32>
    %25 = vector.multi_reduction <add>, %24, %cst_16 [1] : vector<8x16xf32> to vector<8xf32>
    %26 = vector.shape_cast %25 : vector<8xf32> to vector<8x1xf32>
    %27 = tpu.reciprocal %26 {approx = true} : vector<8x1xf32> -> vector<8x1xf32>
    %28 = vector.broadcast %27 : vector<8x1xf32> to vector<8x16xf32>
    %29 = arith.mulf %24, %28 : vector<8x16xf32>
    %cst_17 = arith.constant 1.600000e+01 : f32
    %30 = vector.broadcast %cst_17 : f32 to vector<8x16xf32>
    %31 = arith.mulf %29, %30 : vector<8x16xf32>
    %cst_18 = arith.constant 9.99999997E-7 : f32
    %32 = vector.broadcast %cst_18 : f32 to vector<8x16xf32>
    %33 = arith.addf %31, %32 : vector<8x16xf32>
    %34 = tpu.concatenate %18, %33 in 1 : vector<8x16xf32>, vector<8x16xf32> -> vector<8x32xf32>
    %c0_19 = arith.constant 0 : index
    %c0_20 = arith.constant 0 : index
    %35 = vector.load %arg8[%c0_19, %c0_20] : memref<8x32xf32, #tpu.memory_space<vmem>>, vector<8x32xf32>
    tpu.vector_store %arg8[%c0_19, %c0_20], %34 {strides = array<i32>} : memref<8x32xf32, #tpu.memory_space<vmem>>, vector<8x32xf32>,
    return
  }
  func.func @transform_0(%arg0: i32) -> (i32, i32) {
    %c0_i32 = arith.constant 0 : i32
    %c0_i32_0 = arith.constant 0 : i32
    return %arg0, %c0_i32 : i32, i32
  }
  func.func @transform_1(%arg0: i32) -> (i32, i32) {
    %c0_i32 = arith.constant 0 : i32
    %c0_i32_0 = arith.constant 0 : i32
    %c0_i32_1 = arith.constant 0 : i32
    return %c0_i32, %c0_i32_0 : i32, i32
  }
  func.func @transform_2(%arg0: i32) -> (i32, i32) {
    %c0_i32 = arith.constant 0 : i32
    %c0_i32_0 = arith.constant 0 : i32
    %c0_i32_1 = arith.constant 0 : i32
    return %c0_i32, %c0_i32_0 : i32, i32
  }
  func.func @transform_3(%arg0: i32) -> (i32, i32) {
    %c0_i32 = arith.constant 0 : i32
    %c0_i32_0 = arith.constant 0 : i32
    %c0_i32_1 = arith.constant 0 : i32
    return %c0_i32, %c0_i32_0 : i32, i32
  }
  func.func @transform_4(%arg0: i32) -> (i32, i32) {
    %c0_i32 = arith.constant 0 : i32
    %c0_i32_0 = arith.constant 0 : i32
    %c0_i32_1 = arith.constant 0 : i32
    return %c0_i32, %c0_i32_0 : i32, i32
  }
  func.func @transform_5(%arg0: i32) -> (i32, i32) {
    %c0_i32 = arith.constant 0 : i32
    %c0_i32_0 = arith.constant 0 : i32
    %c0_i32_1 = arith.constant 0 : i32
    return %c0_i32, %c0_i32_0 : i32, i32
  }
  func.func @transform_6(%arg0: i32) -> (i32, i32) {
    %c0_i32 = arith.constant 0 : i32
    %c0_i32_0 = arith.constant 0 : i32
    %c0_i32_1 = arith.constant 0 : i32
    return %c0_i32, %c0_i32_0 : i32, i32
  }
  func.func @transform_7(%arg0: i32) -> (i32, i32) {
    %c0_i32 = arith.constant 0 : i32
    %c0_i32_0 = arith.constant 0 : i32
    return %arg0, %c0_i32 : i32, i32
  }
}

</mosaic_0001>

<bundles_post_ra>
// kernel: enc_forward.1
= control target key start
LH: loop header
LB: loop body
LE: loop exit
PB: predicated region body
PF: predicated region fallthrough
CT: control target
= control target key end

     0   :  { %v410_v0 = vmov 0.0   ;;  %vm411_vm0 = vmmov 0   ;;  %vm45_vm1 = vcmask 719872   ;;  %vm135_vm2 = vcmask 523264   ;;  %s561_s1 = inlined_call_operand.vmem [shape: f32[88,64], index: 1, kind: input, shape index: {}]   ;;  %s562_s0 = inlined_call_operand.vmem [shape: f32[8,88], index: 0, kind: input, shape index: {}]   ;;  %s563_s3 = inlined_call_operand.vmem [shape: f32[64,16], index: 3, kind: input, shape index: {}]   ;;  %s564_s2 = inlined_call_operand.vmem [shape: f32[1,64], index: 2, kind: input, shape index: {}]   ;;  %s565_s5 = inlined_call_operand.vmem [shape: f32[16,32], index: 5, kind: input, shape index: {}]   ;;  %s566_s4 = inlined_call_operand.vmem [shape: f32[1,16], index: 4, kind: input, shape index: {}]   ;;  %s567_s6 = inlined_call_operand.vmem [shape: f32[1,32], index: 6, kind: input, shape index: {}]   ;;  %s568_s7 = inlined_call_operand.vmem [shape: f32[8,32], index: 7, kind: output, shape index: {}]  }
   0x1   :  { %348 = vmatprep.subr.mxu0 %v410_v0  ;;  %v37_v1 = vld [vmem:[%s561_s1 + $0x50] sm:$0xff]  ;;  %v36_v2 = vld [vmem:[%s561_s1 + $0x48] sm:$0xff]  ;;  %370 = vmatprep.mubr.msk.f32.mxu0 %vm411_vm0, %v410_v0  ;;  %v35_v3 = vld [vmem:[%s561_s1 + $0x40] sm:$0xff]  ;;  %vm219_vm3 = vcmask 130048   ;;  %vm293_vm4 = vcmask 261248   ;;  %vm312_vm5 = vcmask 261120  }
   0x2   :  { %349 = vmatpush3.msra.mxu0 %v37_v1  ;;  %373 = vmatprep.subr.mxu1 %v410_v0  ;;  %v34_v4 = vld [vmem:[%s561_s1 + $0x38] sm:$0xff]  ;;  %v33_v5 = vld [vmem:[%s561_s1 + $0x30] sm:$0xff]  ;;  %v32_v6 = vld [vmem:[%s561_s1 + $0x28] sm:$0xff] }
   0x3   :  { %350 = vmatprep.subr.mxu0 %v410_v0  ;;  %389 = vmatprep.mubr.msk.f32.mxu1 %vm411_vm0, %v410_v0  ;;  %v31_v7 = vld [vmem:[%s561_s1 + $0x20] sm:$0xff]  ;;  %v30_v8 = vld [vmem:[%s561_s1 + $0x18] sm:$0xff]  ;;  %v29_v9 = vld [vmem:[%s561_s1 + $0x10] sm:$0xff] }
   0x4   :  { %351 = vmatpush3.msra.mxu0 %v36_v2  ;;  %v28_v10 = vld [vmem:[%s561_s1 + $0x8] sm:$0xff]  ;;  %v27_v11 = vld [vmem:[%s561_s1] sm:$0xff]  ;;  %v127_v13 = vld [vmem:[%s563_s3 + $0x38] sm:$0xff] }
   0x5   :  { %352 = vmatprep.subr.mxu0 %v410_v0  ;;  %v26_v12 = vld [vmem:[%s562_s0] sm:$0xff]  ;;  %374 = vmatpush3.msra.mxu1 %v127_v13  ;;  %v126_v14 = vld [vmem:[%s563_s3 + $0x30] sm:$0xff]  ;;  %v125_v15 = vld [vmem:[%s563_s3 + $0x28] sm:$0xff] }
   0x6   :  { %353 = vmatpush3.msra.mxu0 %v35_v3  ;;  %375 = vmatprep.subr.mxu1 %v410_v0  ;;  %v124_v16 = vld [vmem:[%s563_s3 + $0x20] sm:$0xff]  ;;  %v123_v17 = vld [vmem:[%s563_s3 + $0x18] sm:$0xff]  ;;  %v122_v18 = vld [vmem:[%s563_s3 + $0x10] sm:$0xff] }
   0x7   :  { %354 = vmatprep.subr.mxu0 %v410_v0  ;;  %376 = vmatpush3.msra.mxu1 %v126_v14  ;;  %v121_v19 = vld [vmem:[%s563_s3 + $0x8] sm:$0xff]  ;;  %v120_v20 = vld [vmem:[%s563_s3] sm:$0xff] }
   0x8   :  { %355 = vmatpush3.msra.mxu0 %v34_v4  ;;  %377 = vmatprep.subr.mxu1 %v410_v0  ;;  %v318_v21 = vld [vmem:[%s564_s2] ss:$0 sm:$0xff]  ;;  %v211_v26 = vld [vmem:[%s565_s5 + $0x8] sm:$0xff] }
   0x9   :  { %356 = vmatprep.subr.mxu0 %v410_v0  ;;  %378 = vmatpush3.msra.mxu1 %v125_v15  ;;  %v210_v27 = vld [vmem:[%s565_s5] sm:$0xff] }
   0xa   :  { %357 = vmatpush3.msra.mxu0 %v33_v5  ;;  %379 = vmatprep.subr.mxu1 %v410_v0  ;;  %v320_v28 = vld [vmem:[%s566_s4] ss:$0 sm:$0xff]  ;;  %s412_s4 = smov 112  }
   0xb   :  { %358 = vmatprep.subr.mxu0 %v410_v0  ;;  %380 = vmatpush3.msra.mxu1 %v124_v16  ;;  %v322_v33 = vld [vmem:[%s567_s6] ss:$0 sm:$0xff] }
   0xc   :  { %359 = vmatpush3.msra.mxu0 %v32_v6  ;;  %381 = vmatprep.subr.mxu1 %v410_v0 }
   0xd   :  { %360 = vmatprep.subr.mxu0 %v410_v0  ;;  %382 = vmatpush3.msra.mxu1 %v123_v17 }
   0xe   :  { %361 = vmatpush3.msra.mxu0 %v31_v7  ;;  %383 = vmatprep.subr.mxu1 %v410_v0 }
   0xf   :  { %362 = vmatprep.subr.mxu0 %v410_v0  ;;  %384 = vmatpush3.msra.mxu1 %v122_v18 }
  0x10   :  { %363 = vmatpush3.msra.mxu0 %v30_v8  ;;  %385 = vmatprep.subr.mxu1 %v410_v0 }
  0x11   :  { %364 = vmatprep.subr.mxu0 %v410_v0  ;;  %386 = vmatpush3.msra.mxu1 %v121_v19 }
  0x12   :  { %365 = vmatpush3.msra.mxu0 %v29_v9  ;;  %387 = vmatprep.subr.mxu1 %v410_v0 }
  0x13   :  { %366 = vmatprep.subr.mxu0 %v410_v0  ;;  %388 = vmatpush3.msra.mxu1 %v120_v20 }
  0x14   :  { %367 = vmatpush3.msra.mxu0 %v28_v10  ;;  %392 = vmatprep.subr.mxu1 %v410_v0 }
  0x15   :  { %368 = vmatprep.subr.mxu0 %v410_v0 }
  0x16   :  { %369 = vmatpush3.msra.mxu0 %v27_v11 }
  0x17   :  { %371 = vmatmul.mubr.msk.f32.vlgmr.msra.gmra.mxu0 %vm45_vm1, %v26_v12 }
  0xd7   :  { %v115_v22 = vpop.f32.mrf.mxu0 }
  0xd8   :  { %v116_v23 = vadd.f32 %v318_v21, %v115_v22 }
  0xd9   :  { %v372_v24 = vpop.f32.mrf.mxu0 }
  0xda   :  { %402 = vtanh.f32 %v116_v23 }
  0xe7   :  { %v403_v25 = vpop.eup %402 }
  0xe8   :  { %390 = vmatmul.mubr.msk.f32.vlgmr.msra.gmra.mxu1 %vm135_vm2, %v403_v25 }
  0xe9   :  { %396 = vmatprep.mubr.msk.f32.mxu1 %vm411_vm0, %v410_v0  ;;  %393 = vmatpush3.msra.mxu1 %v211_v26 }
  0xea   :  { %394 = vmatprep.subr.mxu1 %v410_v0 }
  0xeb   :  { %395 = vmatpush3.msra.mxu1 %v210_v27 }
 0x1a8   :  { %v205_v29 = vpop.f32.mrf.mxu1 }
 0x1a9   :  { %v206_v30 = vadd.f32 %v320_v28, %v205_v29 }
 0x1aa   :  { %v391_v31 = vpop.f32.mrf.mxu1 }
 0x1ab   :  { %404 = vtanh.f32 %v206_v30 }
 0x1b8   :  { %v405_v32 = vpop.eup %404 }
 0x1b9   :  { %397 = vmatmul.mubr.msk.f32.vlgmr.msra.gmra.mxu1 %vm219_vm3, %v405_v32 }
 0x279   :  { %v289_v34 = vpop.f32.mrf.mxu1 }
 0x27a   :  { %v290_v35 = vadd.f32 %v322_v33, %v289_v34 }
 0x27b   :  { %v398_v36 = vpop.f32.mrf.mxu1 }
 0x27c   :  { %v294_v37 = vsel %vm293_vm4, %v290_v35, -inf }
 0x27d   :  { %295 = vmax.xlane.f32.xlu0 %v294_v37 }
 0x306   :  { %v296_v38 = vpop.xlane.xlu0 %295 }
 0x307   :  { %v297_v39 = vsub.f32 %v290_v35, %v296_v38 }
 0x309   :  { %v298_v40 = vmul.f32 1.442695, %v297_v39 }
 0x30b   :  { %406 = vpow2.f32 %v298_v40 }
 0x318   :  { %v407_v41 = vpop.eup %406 }
 0x319   :  { %301 = vrot.lane.b32.xlu0 %v407_v41, %s412_s4 }
 0x38b   :  { %v302_v42 = vpop.permute.xlu0 %301 }
 0x38c   :  { %v304_v43 = vsel %vm219_vm3, %v302_v42, 0.0 }
 0x38d   :  { %305 = vadd.xlane.f32.xlu1 %v304_v43 }
 0x416   :  { %v306_v44 = vpop.xlane.xlu1 %305 }
 0x417   :  { %408 = vrcp.f32 %v306_v44 }
 0x424   :  { %v409_v45 = vpop.eup %408 }
 0x425   :  { %v308_v46 = vmul.f32 %v409_v45, %v407_v41 }
 0x427   :  { %v309_v47 = vmul.f32 16.0, %v308_v46 }
 0x429   :  { %v310_v48 = vadd.f32 1e-06, %v309_v47 }
 0x42b   :  { %v311_v49 = vsel %vm219_vm3, %v290_v35, %v310_v48 }
 0x42c   :  { %313 = vst.msk [vmem:[%s568_s7] sm:$0xff] %vm312_vm5, %v311_v49 }

</bundles_post_ra>
